<compile_context>
chip_gen: v7x
topology: tpu7x:2x2x1
jax: 0.10.0
libtpu: 0.0.40
codegen_flags: <defaults>
</compile_context>

<pallas_src>
import functools

import jax
import jax.numpy as jnp
import numpy as np
from jax.experimental import pallas as pl
from jax.experimental.pallas import tpu as pltpu


def mhsa_kernel(x_ref, w_in_ref, w_out_ref, out_ref, *,
                num_heads, scaling, mxu_dtype=None):
    """Whole forward pass, fully resident in VMEM.

    Shapes:
      x_ref    : (T, dim)
      w_in_ref : (dim, 3*att_dim)   fused QKV projection weight (x @ w_in)
      w_out_ref: (att_dim, dim)     output projection weight
      out_ref  : (T, dim)
    """
    att_dim = w_in_ref.shape[1] // 3
    head_dim = att_dim // num_heads

    cast = (lambda a: a.astype(mxu_dtype)) if mxu_dtype is not None else (lambda a: a)

    x = x_ref[...]                                                    # (T, dim)
    w_in = w_in_ref[...]                                              # (dim, 3A)
    w_out = w_out_ref[...]                                            # (A, dim)

    # (1) Fused QKV projection: single MXU push, 3*att_dim live output lanes.
    qkv = jnp.dot(cast(x), cast(w_in),
                  preferred_element_type=jnp.float32)                 # (T, 3A)

    # (2) Per-head attention core.  Static loop over 2-D tiles (no 3-D
    #     reshape/transpose relayouts); same MXU push count as a batched bmm.
    o_heads = []
    for h in range(num_heads):
        q0 = h * head_dim
        k0 = att_dim + h * head_dim
        v0 = 2 * att_dim + h * head_dim
        # Fold 1/sqrt(head_dim) into q: O(T*hd) instead of O(T*T) per head.
        qh = qkv[:, q0:q0 + head_dim] * scaling                       # (T, hd)
        kh = qkv[:, k0:k0 + head_dim]                                 # (T, hd)
        vh = qkv[:, v0:v0 + head_dim]                                 # (T, hd)

        # q @ k^T by contracting the last axes of both (no transpose relayout).
        s = jax.lax.dot_general(cast(qh), cast(kh),
                                (((1,), (1,)), ((), ())),
                                preferred_element_type=jnp.float32)   # (T, T)

        # own_softmax: global max/sum over the whole (T, T) score matrix.
        m = jnp.max(s, axis=(0, 1), keepdims=True)                    # (1, 1)
        e = jnp.exp(s - m)                                            # (T, T) f32
        # Exact reciprocal (not approx) to hold the 1e-5 test tolerance.
        inv = 1.0 / jnp.sum(e, axis=(0, 1), keepdims=True)            # (1, 1)

        # PV matmul first; normalize after with one per-head scalar multiply.
        o_heads.append(jnp.dot(cast(e), cast(vh),
                               preferred_element_type=jnp.float32) * inv)

    # Reassemble (T, att_dim) — a few XLU lane-concat ops at this size.
    o_flat = jnp.concatenate(o_heads, axis=-1)                        # (T, A)

    # (3) Fused output projection: single MXU push; head-sum rides the K axis.
    out = jnp.dot(cast(o_flat), cast(w_out),
                  preferred_element_type=jnp.float32)                 # (T, dim)
    out_ref[...] = out.astype(out_ref.dtype)                          # one lane-dense store


def mhsa_pallas(x, w_in, w_out, num_heads, mxu_dtype=None):
    """x: (T, dim); w_in: (dim, 3*att_dim); w_out: (att_dim, dim).

    Weights are the transposed PyTorch Linear weights, i.e. x @ w == Linear(x).
    Weights are passed UNTOUCHED — no per-call pre-shaping in the hot path.
    """
    tgt_len, dim = x.shape
    att_dim = w_in.shape[1] // 3
    head_dim = att_dim // num_heads
    scaling = head_dim ** (-0.5)

    kernel = functools.partial(mhsa_kernel, num_heads=num_heads,
                               scaling=scaling, mxu_dtype=mxu_dtype)

    vmem = pl.BlockSpec(memory_space=pltpu.MemorySpace.VMEM)

    # No grid: whole-array VMEM residency, no pipelining overhead for a
    # latency-bound kernel this small.
    return pl.pallas_call(
        kernel,
        out_shape=jax.ShapeDtypeStruct((tgt_len, dim), x.dtype),
        in_specs=[vmem, vmem, vmem],
        out_specs=vmem,
    )(x, w_in, w_out)


def mhsa_reference(x, w_in, w_out, num_heads):
    """Pure-JAX reference mirroring the PyTorch module exactly."""
    tgt_len, dim = x.shape
    att_dim = w_in.shape[1] // 3
    head_dim = att_dim // num_heads
    scaling = head_dim ** (-0.5)

    qkv = x @ w_in
    q, k, v = jnp.split(qkv, 3, axis=-1)
    q = q.reshape(tgt_len, num_heads, head_dim).transpose(1, 0, 2)
    k = k.reshape(-1, num_heads, head_dim).transpose(1, 0, 2)
    v = v.reshape(-1, num_heads, head_dim).transpose(1, 0, 2)

    scores = jnp.einsum("htd,hsd->hts", q, k) * scaling
    maxes = jnp.max(scores, axis=(1, 2), keepdims=True)
    e = jnp.exp(scores - maxes)
    scores = e / jnp.sum(e, axis=(1, 2), keepdims=True)

    out = jnp.einsum("hts,hsd->htd", scores, v)
    out = out.transpose(1, 0, 2).reshape(tgt_len, att_dim)
    return out @ w_out


if __name__ == "__main__":
    # Small shapes consistent with the module's forward.
    tgt_len, dim, num_heads, att_dim = 8, 32, 4, 32

    key = jax.random.PRNGKey(0)
    kx, kin, kout = jax.random.split(key, 3)

    x = jax.random.normal(kx, (tgt_len, dim), dtype=jnp.float32)
    # nn.Linear(dim, 3*att_dim) weight stored transposed: (dim, 3*att_dim)
    w_in = jax.random.normal(kin, (dim, 3 * att_dim), dtype=jnp.float32) * 0.1
    # nn.Linear(att_dim, dim) weight stored transposed: (att_dim, dim)
    w_out = jax.random.normal(kout, (att_dim, dim), dtype=jnp.float32) * 0.1

    # NOTE: the original test is fp16; f32 here so the 1e-5 tolerance holds.
    # For production shapes on v6e/v7x, pass mxu_dtype=jnp.bfloat16 (gated —
    # it will not meet the 1e-5 f32 tolerance).
    out = mhsa_pallas(x, w_in, w_out, num_heads)
    out = jax.block_until_ready(out)

    ref = mhsa_reference(x, w_in, w_out, num_heads)
    np.testing.assert_allclose(np.asarray(out), np.asarray(ref), rtol=1e-5, atol=1e-5)

    print("KERNEL_OK")
</pallas_src>

<mosaic_0001>
module attributes {stable_mosaic.version = 11 : i64} {
  func.func @mhsa_kernel(%arg0: memref<8x32xf32, #tpu.memory_space<vmem>>, %arg1: memref<32x96xf32, #tpu.memory_space<vmem>>, %arg2: memref<32x32xf32, #tpu.memory_space<vmem>>, %arg3: memref<8x32xf32, #tpu.memory_space<vmem>>) attributes {dimension_semantics = [], scalar_prefetch = 0 : i64, scratch_operands = 0 : i64, tpu.core_type = #tpu.core_type<tc>} {
    %c0 = arith.constant 0 : index
    %c0_0 = arith.constant 0 : index
    %0 = vector.load %arg0[%c0, %c0_0] : memref<8x32xf32, #tpu.memory_space<vmem>>, vector<8x32xf32>
    %c0_1 = arith.constant 0 : index
    %c0_2 = arith.constant 0 : index
    %1 = vector.load %arg1[%c0_1, %c0_2] : memref<32x96xf32, #tpu.memory_space<vmem>>, vector<32x96xf32>
    %c0_3 = arith.constant 0 : index
    %c0_4 = arith.constant 0 : index
    %2 = vector.load %arg2[%c0_3, %c0_4] : memref<32x32xf32, #tpu.memory_space<vmem>>, vector<32x32xf32>
    %cst = arith.constant dense<0.000000e+00> : vector<8x96xf32>
    %3 = tpu.matmul %0, %1, %cst {dimension_numbers = #tpu.dot_dimension_numbers<[1], [0], [0], [1], [0, 0, 1, 1], [], []>} : vector<8x32xf32>, vector<32x96xf32>, vector<8x96xf32> -> vector<8x96xf32>
    %4 = vector.extract_strided_slice %3 {offsets = [0, 0], sizes = [8, 8], strides = [1, 1]} : vector<8x96xf32> to vector<8x8xf32>
    %cst_5 = arith.constant 0.353553385 : f32
    %5 = vector.broadcast %cst_5 : f32 to vector<8x8xf32>
    %6 = arith.mulf %4, %5 : vector<8x8xf32>
    %7 = vector.extract_strided_slice %3 {offsets = [0, 32], sizes = [8, 8], strides = [1, 1]} : vector<8x96xf32> to vector<8x8xf32>
    %8 = vector.extract_strided_slice %3 {offsets = [0, 64], sizes = [8, 8], strides = [1, 1]} : vector<8x96xf32> to vector<8x8xf32>
    %cst_6 = arith.constant dense<0.000000e+00> : vector<8x8xf32>
    %9 = tpu.matmul %6, %7, %cst_6 {dimension_numbers = #tpu.dot_dimension_numbers<[1], [1], [0], [0], [0, 0, 1, 0], [], []>} : vector<8x8xf32>, vector<8x8xf32>, vector<8x8xf32> -> vector<8x8xf32>
    %10 = vector.shape_cast %9 : vector<8x8xf32> to vector<1x8x8xf32>
    %cst_7 = arith.constant dense<0xFF800000> : vector<1xf32>
    %11 = vector.multi_reduction <maximumf>, %10, %cst_7 [1, 2] : vector<1x8x8xf32> to vector<1xf32>
    %12 = vector.shape_cast %11 : vector<1xf32> to vector<1x1x1xf32>
    %13 = vector.extract %12[0, 0, 0] : f32 from vector<1x1x1xf32>
    %14 = vector.broadcast %13 : f32 to vector<1x1xf32>
    %15 = vector.broadcast %14 : vector<1x1xf32> to vector<8x8xf32>
    %16 = arith.subf %9, %15 : vector<8x8xf32>
    %17 = math.exp %16 : vector<8x8xf32>
    %18 = vector.shape_cast %17 : vector<8x8xf32> to vector<1x8x8xf32>
    %cst_8 = arith.constant dense<0.000000e+00> : vector<1xf32>
    %19 = vector.multi_reduction <add>, %18, %cst_8 [1, 2] : vector<1x8x8xf32> to vector<1xf32>
    %20 = vector.shape_cast %19 : vector<1xf32> to vector<1x1x1xf32>
    %21 = vector.extract %20[0, 0, 0] : f32 from vector<1x1x1xf32>
    %22 = vector.broadcast %21 : f32 to vector<1x1xf32>
    %cst_9 = arith.constant 1.000000e+00 : f32
    %23 = vector.broadcast %cst_9 : f32 to vector<1x1xf32>
    %24 = arith.divf %23, %22 : vector<1x1xf32>
    %cst_10 = arith.constant dense<0.000000e+00> : vector<8x8xf32>
    %25 = tpu.matmul %17, %8, %cst_10 {dimension_numbers = #tpu.dot_dimension_numbers<[1], [0], [0], [1], [0, 0, 1, 1], [], []>} : vector<8x8xf32>, vector<8x8xf32>, vector<8x8xf32> -> vector<8x8xf32>
    %26 = vector.broadcast %24 : vector<1x1xf32> to vector<8x8xf32>
    %27 = arith.mulf %25, %26 : vector<8x8xf32>
    %28 = vector.extract_strided_slice %3 {offsets = [0, 8], sizes = [8, 8], strides = [1, 1]} : vector<8x96xf32> to vector<8x8xf32>
    %cst_11 = arith.constant 0.353553385 : f32
    %29 = vector.broadcast %cst_11 : f32 to vector<8x8xf32>
    %30 = arith.mulf %28, %29 : vector<8x8xf32>
    %31 = vector.extract_strided_slice %3 {offsets = [0, 40], sizes = [8, 8], strides = [1, 1]} : vector<8x96xf32> to vector<8x8xf32>
    %32 = vector.extract_strided_slice %3 {offsets = [0, 72], sizes = [8, 8], strides = [1, 1]} : vector<8x96xf32> to vector<8x8xf32>
    %cst_12 = arith.constant dense<0.000000e+00> : vector<8x8xf32>
    %33 = tpu.matmul %30, %31, %cst_12 {dimension_numbers = #tpu.dot_dimension_numbers<[1], [1], [0], [0], [0, 0, 1, 0], [], []>} : vector<8x8xf32>, vector<8x8xf32>, vector<8x8xf32> -> vector<8x8xf32>
    %34 = vector.shape_cast %33 : vector<8x8xf32> to vector<1x8x8xf32>
    %cst_13 = arith.constant dense<0xFF800000> : vector<1xf32>
    %35 = vector.multi_reduction <maximumf>, %34, %cst_13 [1, 2] : vector<1x8x8xf32> to vector<1xf32>
    %36 = vector.shape_cast %35 : vector<1xf32> to vector<1x1x1xf32>
    %37 = vector.extract %36[0, 0, 0] : f32 from vector<1x1x1xf32>
    %38 = vector.broadcast %37 : f32 to vector<1x1xf32>
    %39 = vector.broadcast %38 : vector<1x1xf32> to vector<8x8xf32>
    %40 = arith.subf %33, %39 : vector<8x8xf32>
    %41 = math.exp %40 : vector<8x8xf32>
    %42 = vector.shape_cast %41 : vector<8x8xf32> to vector<1x8x8xf32>
    %cst_14 = arith.constant dense<0.000000e+00> : vector<1xf32>
    %43 = vector.multi_reduction <add>, %42, %cst_14 [1, 2] : vector<1x8x8xf32> to vector<1xf32>
    %44 = vector.shape_cast %43 : vector<1xf32> to vector<1x1x1xf32>
    %45 = vector.extract %44[0, 0, 0] : f32 from vector<1x1x1xf32>
    %46 = vector.broadcast %45 : f32 to vector<1x1xf32>
    %cst_15 = arith.constant 1.000000e+00 : f32
    %47 = vector.broadcast %cst_15 : f32 to vector<1x1xf32>
    %48 = arith.divf %47, %46 : vector<1x1xf32>
    %cst_16 = arith.constant dense<0.000000e+00> : vector<8x8xf32>
    %49 = tpu.matmul %41, %32, %cst_16 {dimension_numbers = #tpu.dot_dimension_numbers<[1], [0], [0], [1], [0, 0, 1, 1], [], []>} : vector<8x8xf32>, vector<8x8xf32>, vector<8x8xf32> -> vector<8x8xf32>
    %50 = vector.broadcast %48 : vector<1x1xf32> to vector<8x8xf32>
    %51 = arith.mulf %49, %50 : vector<8x8xf32>
    %52 = vector.extract_strided_slice %3 {offsets = [0, 16], sizes = [8, 8], strides = [1, 1]} : vector<8x96xf32> to vector<8x8xf32>
    %cst_17 = arith.constant 0.353553385 : f32
    %53 = vector.broadcast %cst_17 : f32 to vector<8x8xf32>
    %54 = arith.mulf %52, %53 : vector<8x8xf32>
    %55 = vector.extract_strided_slice %3 {offsets = [0, 48], sizes = [8, 8], strides = [1, 1]} : vector<8x96xf32> to vector<8x8xf32>
    %56 = vector.extract_strided_slice %3 {offsets = [0, 80], sizes = [8, 8], strides = [1, 1]} : vector<8x96xf32> to vector<8x8xf32>
    %cst_18 = arith.constant dense<0.000000e+00> : vector<8x8xf32>
    %57 = tpu.matmul %54, %55, %cst_18 {dimension_numbers = #tpu.dot_dimension_numbers<[1], [1], [0], [0], [0, 0, 1, 0], [], []>} : vector<8x8xf32>, vector<8x8xf32>, vector<8x8xf32> -> vector<8x8xf32>
    %58 = vector.shape_cast %57 : vector<8x8xf32> to vector<1x8x8xf32>
    %cst_19 = arith.constant dense<0xFF800000> : vector<1xf32>
    %59 = vector.multi_reduction <maximumf>, %58, %cst_19 [1, 2] : vector<1x8x8xf32> to vector<1xf32>
    %60 = vector.shape_cast %59 : vector<1xf32> to vector<1x1x1xf32>
    %61 = vector.extract %60[0, 0, 0] : f32 from vector<1x1x1xf32>
    %62 = vector.broadcast %61 : f32 to vector<1x1xf32>
    %63 = vector.broadcast %62 : vector<1x1xf32> to vector<8x8xf32>
    %64 = arith.subf %57, %63 : vector<8x8xf32>
    %65 = math.exp %64 : vector<8x8xf32>
    %66 = vector.shape_cast %65 : vector<8x8xf32> to vector<1x8x8xf32>
    %cst_20 = arith.constant dense<0.000000e+00> : vector<1xf32>
    %67 = vector.multi_reduction <add>, %66, %cst_20 [1, 2] : vector<1x8x8xf32> to vector<1xf32>
    %68 = vector.shape_cast %67 : vector<1xf32> to vector<1x1x1xf32>
    %69 = vector.extract %68[0, 0, 0] : f32 from vector<1x1x1xf32>
    %70 = vector.broadcast %69 : f32 to vector<1x1xf32>
    %cst_21 = arith.constant 1.000000e+00 : f32
    %71 = vector.broadcast %cst_21 : f32 to vector<1x1xf32>
    %72 = arith.divf %71, %70 : vector<1x1xf32>
    %cst_22 = arith.constant dense<0.000000e+00> : vector<8x8xf32>
    %73 = tpu.matmul %65, %56, %cst_22 {dimension_numbers = #tpu.dot_dimension_numbers<[1], [0], [0], [1], [0, 0, 1, 1], [], []>} : vector<8x8xf32>, vector<8x8xf32>, vector<8x8xf32> -> vector<8x8xf32>
    %74 = vector.broadcast %72 : vector<1x1xf32> to vector<8x8xf32>
    %75 = arith.mulf %73, %74 : vector<8x8xf32>
    %76 = vector.extract_strided_slice %3 {offsets = [0, 24], sizes = [8, 8], strides = [1, 1]} : vector<8x96xf32> to vector<8x8xf32>
    %cst_23 = arith.constant 0.353553385 : f32
    %77 = vector.broadcast %cst_23 : f32 to vector<8x8xf32>
    %78 = arith.mulf %76, %77 : vector<8x8xf32>
    %79 = vector.extract_strided_slice %3 {offsets = [0, 56], sizes = [8, 8], strides = [1, 1]} : vector<8x96xf32> to vector<8x8xf32>
    %80 = vector.extract_strided_slice %3 {offsets = [0, 88], sizes = [8, 8], strides = [1, 1]} : vector<8x96xf32> to vector<8x8xf32>
    %cst_24 = arith.constant dense<0.000000e+00> : vector<8x8xf32>
    %81 = tpu.matmul %78, %79, %cst_24 {dimension_numbers = #tpu.dot_dimension_numbers<[1], [1], [0], [0], [0, 0, 1, 0], [], []>} : vector<8x8xf32>, vector<8x8xf32>, vector<8x8xf32> -> vector<8x8xf32>
    %82 = vector.shape_cast %81 : vector<8x8xf32> to vector<1x8x8xf32>
    %cst_25 = arith.constant dense<0xFF800000> : vector<1xf32>
    %83 = vector.multi_reduction <maximumf>, %82, %cst_25 [1, 2] : vector<1x8x8xf32> to vector<1xf32>
    %84 = vector.shape_cast %83 : vector<1xf32> to vector<1x1x1xf32>
    %85 = vector.extract %84[0, 0, 0] : f32 from vector<1x1x1xf32>
    %86 = vector.broadcast %85 : f32 to vector<1x1xf32>
    %87 = vector.broadcast %86 : vector<1x1xf32> to vector<8x8xf32>
    %88 = arith.subf %81, %87 : vector<8x8xf32>
    %89 = math.exp %88 : vector<8x8xf32>
    %90 = vector.shape_cast %89 : vector<8x8xf32> to vector<1x8x8xf32>
    %cst_26 = arith.constant dense<0.000000e+00> : vector<1xf32>
    %91 = vector.multi_reduction <add>, %90, %cst_26 [1, 2] : vector<1x8x8xf32> to vector<1xf32>
    %92 = vector.shape_cast %91 : vector<1xf32> to vector<1x1x1xf32>
    %93 = vector.extract %92[0, 0, 0] : f32 from vector<1x1x1xf32>
    %94 = vector.broadcast %93 : f32 to vector<1x1xf32>
    %cst_27 = arith.constant 1.000000e+00 : f32
    %95 = vector.broadcast %cst_27 : f32 to vector<1x1xf32>
    %96 = arith.divf %95, %94 : vector<1x1xf32>
    %cst_28 = arith.constant dense<0.000000e+00> : vector<8x8xf32>
    %97 = tpu.matmul %89, %80, %cst_28 {dimension_numbers = #tpu.dot_dimension_numbers<[1], [0], [0], [1], [0, 0, 1, 1], [], []>} : vector<8x8xf32>, vector<8x8xf32>, vector<8x8xf32> -> vector<8x8xf32>
    %98 = vector.broadcast %96 : vector<1x1xf32> to vector<8x8xf32>
    %99 = arith.mulf %97, %98 : vector<8x8xf32>
    %100 = tpu.concatenate %27, %51, %75, %99 in 1 : vector<8x8xf32>, vector<8x8xf32>, vector<8x8xf32>, vector<8x8xf32> -> vector<8x32xf32>
    %cst_29 = arith.constant dense<0.000000e+00> : vector<8x32xf32>
    %101 = tpu.matmul %100, %2, %cst_29 {dimension_numbers = #tpu.dot_dimension_numbers<[1], [0], [0], [1], [0, 0, 1, 1], [], []>} : vector<8x32xf32>, vector<32x32xf32>, vector<8x32xf32> -> vector<8x32xf32>
    %c0_30 = arith.constant 0 : index
    %c0_31 = arith.constant 0 : index
    %102 = vector.load %arg3[%c0_30, %c0_31] : memref<8x32xf32, #tpu.memory_space<vmem>>, vector<8x32xf32>
    tpu.vector_store %arg3[%c0_30, %c0_31], %101 {strides = array<i32>} : memref<8x32xf32, #tpu.memory_space<vmem>>, vector<8x32xf32>,
    return
  }
}

</mosaic_0001>

<bundles_post_ra>
// kernel: tpu_custom_call.1
= control target key start
LH: loop header
LB: loop body
LE: loop exit
PB: predicated region body
PF: predicated region fallthrough
CT: control target
= control target key end

     0   :  { %8 = vsyncpa [#allocation3], 0  ;;  %s1413_s0 = inlined_call_operand.hbm [shape: f32[8,32], index: 0, kind: input, shape index: {}]   ;;  %s1414_s1 = inlined_call_operand.hbm [shape: f32[32,96], index: 1, kind: input, shape index: {}]   ;;  %s1415_s2 = inlined_call_operand.hbm [shape: f32[32,32], index: 2, kind: input, shape index: {}]   ;;  %s1416_s3 = inlined_call_operand.hbm [shape: f32[8,32], index: 3, kind: output, shape index: {}]  }
   0x1   :  { %9 = vsyncpa [#allocation6], 0 }
   0x2   :  { %10 = vsyncpa [#allocation4], 0  ;;  %s1236_s12 = smov [#allocation5]   ;;  %s1142_s16 = scalar_lea.hbm %s1414_s1, 512 }
   0x3   :  { %s26_s13 = sshll.u32 %s1236_s12, 4  ;;  %p1143_p0 = scmp.ne.s32.totalorder %s1414_s1, %s1142_s16  ;;  %s27_s13 = int_to_ptr.vmem [resolvable:$true] %s26_s13 }
   0x4   :  { %p1146_p1 = scmp.lt.u32.totalorder %s1142_s16, %s1414_s1 }
   0x6   :  { %p1148_p2 = pnand %p1146_p1, %p1143_p0 }
   0x8   :  { %1151 = shalt.err (!%p1148_p2)
}
   0x9   :  { %s1152_s21 = scalar_lea.vmem %s27_s13, 512  ;;  %p1157_p4 = scmp.lt.s32.totalorder %s27_s13, %s27_s13 }
   0xa   :  { %p1153_p3 = scmp.ne.s32.totalorder %s27_s13, %s1152_s21  ;;  %p1158_p5 = scmp.lt.s32.totalorder %s1152_s21, %s1152_s21 }
   0xc   :  { %p1159_p6 = por %p1158_p5, %p1157_p4 }
   0xe   :  { %p1160_p7 = pnand %p1159_p6, %p1153_p3 }
  0x10   :  { %1163 = shalt.err (!%p1160_p7)
}
  0x11   :  { %s1237_s22 = smov 128   ;;  %s1238_s23 = smov 8  }
  0x12   :  { %32 = dma.hbm_to_vmem [thread:$0]  %s1414_s1, 512, %s27_s13, [#allocation6], %s1237_s22, %s1237_s22, %s1238_s23  }
  0x13   :  { %s1239_s26 = smov [#allocation2]   ;;  %s1240_s28 = smov [#allocation7]  }
  0x14   :  { %s17_s27 = sshll.u32 %s1239_s26, 4  ;;  %s38_s29 = sshll.u32 %s1240_s28, 4  ;;  %s18_s27 = int_to_ptr.vmem [resolvable:$true] %s17_s27  ;;  %s39_s29 = int_to_ptr.vmem [resolvable:$true] %s38_s29 }
  0x15   :  { %s1164_s5 = scalar_lea.hbm %s1413_s0, 128 }
  0x16   :  { %p1165_p8 = scmp.ne.s32.totalorder %s1413_s0, %s1164_s5  ;;  %p1168_p9 = scmp.lt.u32.totalorder %s1164_s5, %s1413_s0 }
  0x18   :  { %p1170_p10 = pnand %p1168_p9, %p1165_p8 }
  0x1a   :  { %1173 = shalt.err (!%p1170_p10)
}
  0x1b   :  { %s1174_s1 = scalar_lea.vmem %s18_s27, 128  ;;  %p1179_p12 = scmp.lt.s32.totalorder %s18_s27, %s18_s27 }
  0x1c   :  { %p1175_p11 = scmp.ne.s32.totalorder %s18_s27, %s1174_s1  ;;  %p1180_p13 = scmp.lt.s32.totalorder %s1174_s1, %s1174_s1 }
  0x1e   :  { %p1181_p0 = por %p1180_p13, %p1179_p12 }
  0x20   :  { %p1182_p1 = pnand %p1181_p0, %p1175_p11 }
  0x22   :  { %1185 = shalt.err (!%p1182_p1)
}
  0x23   :  { %20 = dma.hbm_to_vmem [thread:$0]  %s1413_s0, 128, %s18_s27, [#allocation3]  }
  0x24   :  { %s1186_s14 = scalar_lea.hbm %s1415_s2, 512 }
  0x25   :  { %p1187_p2 = scmp.ne.s32.totalorder %s1415_s2, %s1186_s14  ;;  %p1190_p3 = scmp.lt.u32.totalorder %s1186_s14, %s1415_s2 }
  0x27   :  { %p1192_p4 = pnand %p1190_p3, %p1187_p2 }
  0x29   :  { %1195 = shalt.err (!%p1192_p4)
}
  0x2a   :  { %s1196_s19 = scalar_lea.vmem %s39_s29, 512  ;;  %p1201_p6 = scmp.lt.s32.totalorder %s39_s29, %s39_s29 }
  0x2b   :  { %p1197_p5 = scmp.ne.s32.totalorder %s39_s29, %s1196_s19  ;;  %p1202_p7 = scmp.lt.s32.totalorder %s1196_s19, %s1196_s19 }
  0x2d   :  { %p1203_p8 = por %p1202_p7, %p1201_p6 }
  0x2f   :  { %p1204_p9 = pnand %p1203_p8, %p1197_p5 }
  0x31   :  { %1207 = shalt.err (!%p1204_p9)
}
  0x32   :  { %44 = dma.hbm_to_vmem [thread:$0]  %s1415_s2, 512, %s39_s29, [#allocation6], %s1237_s22, %s1237_s22, %s1238_s23  }
  0x33   :  { %1230 = dma.done.wait [#allocation3], 128  }
  0x34   :  { %1231 = vsyncadd [#allocation3], 4294967168 }
  0x35   :  { %1232 = dma.done.wait [#allocation6], 1024  }
  0x36   :  { %1233 = vsyncadd [#allocation6], 4294966272  ;;  %v1241_v0 = vmov 0.0|0.0   ;;  %vm1242_vm0 = vmmov 0   ;;  %v1243_v1 = vmov 0.0   ;;  %v55_v2 = vld [vmem:[#allocation5] sm:$0xff] }
  0x37   :  { %1076 = vmatprep.subr.bf16.mxu0 %v1241_v0  ;;  %1022 = vmatprep.mubr.msk.f32.mxu0 %vm1242_vm0, %v1243_v1  ;;  %v56_v3 = vld [vmem:[#allocation5 + $0x8] sm:$0xff]  ;;  %v57_v4 = vld [vmem:[#allocation5 + $0x10] sm:$0xff]  ;;  %v58_v6 = vld [vmem:[#allocation5 + $0x18] sm:$0xff]  ;;  %vm63_vm1 = vcmask 261120   ;;  %s1244_s2 = smov 64   ;;  %s1245_s21 = smov 96  }
  0x38   :  { %1025 = vmatprep.subr.mxu1 %v1243_v1  ;;  %1027 = vmatprep.mubr.msk.f32.mxu1 %vm1242_vm0, %v1243_v1  ;;  %v1077_v5 = vpack.c.bf16 %v56_v3, %v55_v2  ;;  %v1080_v7 = vpack.c.bf16 %v58_v6, %v57_v4  ;;  %v54_v8 = vld [vmem:[#allocation2] sm:$0xff]  ;;  %s1246_s22 = smov 88   ;;  %s1247_s24 = smov 120   ;;  %vm141_vm2 = vcmask 64512   ;;  %vm880_vm3 = vcmask 130048  }
  0x39   :  { %s1248_s25 = smov 80   ;;  %s1249_s26 = smov 112   ;;  %vm882_vm4 = vcmask 195584  }
  0x3a   :  { %1078 = vmatpush3.bf16.msra.mxu0 %v1077_v5  ;;  %s1250_s28 = smov 104   ;;  %s1251_s29 = smov 48  }
  0x3b   :  { %1079 = vmatprep.subr.bf16.mxu0 %v1241_v0  ;;  %s1252_s30 = smov 72   ;;  %s1253_s8 = smov 56  }
  0x3c   :  { %s1254_s9 = smov 40   ;;  %s1255_s11 = smov 16  }
  0x3d   :  { %s1257_s13 = smov [#allocation8]  }
  0x3e   :  { %1081 = vmatpush3.bf16.msra.mxu0 %v1080_v7  ;;  %s964_s14 = sshll.u32 %s1257_s13, 4  ;;  %s965_s14 = int_to_ptr.vmem [resolvable:$true] %s964_s14 }
  0x3f   :  { %1045 = vmatprep.subr.mxu0 %v1243_v1  ;;  %s1208_s15 = scalar_lea.vmem %s965_s14, 128  ;;  %p1213_p11 = scmp.lt.s32.totalorder %s965_s14, %s965_s14 }
  0x40   :  { %p1209_p10 = scmp.ne.s32.totalorder %s965_s14, %s1208_s15  ;;  %p1214_p12 = scmp.lt.s32.totalorder %s1208_s15, %s1208_s15 }
  0x41   :  { %1023 = vmatmul.mubr.msk.f32.vlgmr.msra.gmra.mrb[0].mxu0 %vm63_vm1, %v54_v8 }
  0x42   :  { %1047 = vmatprep.mubr.msk.f32.mxu0 %vm1242_vm0, %v1243_v1  ;;  %p1215_p13 = por %p1214_p12, %p1213_p11 }
  0x44   :  { %p1216_p0 = pnand %p1215_p13, %p1209_p10 }
 0x114   :  { %v1331_v9 = vpop.f32.mrb[0].mxu0 }
 0x115   :  { %244 = vrot.lane.b32.xlu1 %v1331_v9, %s1244_s2  ;;  %139 = vrot.lane.b32.xlu0 %v1331_v9, %s1245_s21  ;;  %v1024_v10 = vpop.f32.mrb[1].mxu0  ;;  %v137_v11 = vmul.f32 0.35355338, %v1331_v9 }
 0x119   :  { %323 = vrot.lane.b32.xlu1 %v1331_v9, %s1246_s22 }
 0x11d   :  { %321 = vrot.lane.b32.xlu1 %v137_v11, %s1247_s24 }
 0x121   :  { %505 = vrot.lane.b32.xlu1 %v1331_v9, %s1248_s25 }
 0x125   :  { %503 = vrot.lane.b32.xlu1 %v137_v11, %s1249_s26 }
 0x187   :  { %v245_v12 = vpop.permute.xlu1 %244  ;;  %v140_v13 = vpop.permute.xlu0 %139 }
 0x188   :  { %1026 = vmatpush3.xpose.msk.msra.mxu1 %vm141_vm2, %v140_v13 }
 0x189   :  { %1030 = vmatprep.subr.mxu1 %v1243_v1 }
 0x18b   :  { %v324_v14 = vpop.permute.xlu1 %323  ;;  %1028 = vmatmul.mubr.msk.f32.vlgmr.msra.gmra.mrb[0].mxu1 %vm141_vm2, %v137_v11 }
 0x18c   :  { %1031 = vmatpush3.msra.mxu1 %v245_v12  ;;  %1032 = vmatprep.mubr.msk.f32.mxu1 %vm1242_vm0, %v1243_v1 }
 0x18d   :  { %1035 = vmatprep.subr.mxu1 %v1243_v1 }
 0x18f   :  { %v322_v15 = vpop.permute.xlu1 %321 }
 0x193   :  { %v506_v16 = vpop.permute.xlu1 %505 }
 0x194   :  { %1046 = vmatpush3.xpose.msk.msra.mxu0 %vm141_vm2, %v506_v16 }
 0x195   :  { %1055 = vmatprep.subr.mxu0 %v1243_v1 }
 0x197   :  { %v504_v17 = vpop.permute.xlu1 %503 }
 0x198   :  { %1048 = vmatmul.mubr.msk.f32.vlgmr.msra.gmra.mrb[2].mxu0 %vm141_vm2, %v504_v17 }
 0x199   :  { %1057 = vmatprep.mubr.msk.f32.mxu0 %vm1242_vm0, %v1243_v1 }
 0x25e   :  { %v213_v18 = vpop.f32.mrb[0].mxu1 }
 0x25f   :  { %v1029_v19 = vpop.f32.mrb[1].mxu1  ;;  %v217_v20 = vsel %vm141_vm2, %v213_v18, -inf }
 0x260   :  { %218 = vmax.xlane.f32.xlu0 %v217_v20 }
 0x26b   :  { %v1350_v21 = vpop.f32.mrb[2].mxu0 }
 0x26c   :  { %v1049_v22 = vpop.f32.mrb[3].mxu0  ;;  %v581_v35 = vsel %vm141_vm2, %v1350_v21, -inf }
 0x2ed   :  { %v219_v23 = vpop.xlane.xlu0 %218 }
 0x2ee   :  { %v220_v24 = vrot.slane %v219_v23, 4 }
 0x2f0   :  { %v221_v25 = vmax.f32 %v219_v23, %v220_v24 }
 0x2f2   :  { %v222_v26 = vrot.slane %v221_v25, 2 }
 0x2f4   :  { %v223_v27 = vmax.f32 %v221_v25, %v222_v26 }
 0x2f6   :  { %v224_v28 = vrot.slane %v223_v27, 1 }
 0x2f8   :  { %v225_v29 = vmax.f32 %v223_v27, %v224_v28 }
 0x2fa   :  { %1088 = vpush %v225_v29 }
 0x32b   :  { %s1089_s27 = spop %1088 }
 0x32c   :  { %v227_v30 = vstv %s1089_s27 }
 0x32d   :  { %v228_v31 = vsub.f32 %v213_v18, %v227_v30 }
 0x32f   :  { %v229_v32 = vmul.f32 1.442695, %v228_v31 }
 0x331   :  { %1126 = vpow2.f32 %v229_v32 }
 0x33b   :  { %v1127_v33 = vpop.eup %1126 }
 0x33c   :  { %1033 = vmatmul.mubr.msk.f32.vlgmr.msra.gmra.mrb[2].mxu1 %vm141_vm2, %v1127_v33  ;;  %v231_v34 = vsel %vm141_vm2, %v1127_v33, 0.0 }
 0x33d   :  { %1036 = vmatpush3.xpose.msk.msra.mxu1 %vm141_vm2, %v324_v14  ;;  %232 = vadd.xlane.f32.xlu1 %v231_v34 }
 0x33e   :  { %1037 = vmatprep.mubr.msk.f32.mxu1 %vm1242_vm0, %v1243_v1  ;;  %1040 = vmatprep.subr.mxu1 %v1243_v1 }
 0x340   :  { %1038 = vmatmul.mubr.msk.f32.vlgmr.msra.gmra.mrb[4].mxu1 %vm141_vm2, %v322_v15 }
 0x341   :  { %1042 = vmatprep.mubr.msk.f32.mxu1 %vm1242_vm0, %v1243_v1 }
 0x34e   :  { %685 = vrot.lane.b32.xlu1 %v137_v11, %s1250_s28 }
 0x372   :  { %582 = vmax.xlane.f32.xlu1 %v581_v35 }
 0x383   :  { %608 = vrot.lane.b32.xlu1 %v1331_v9, %s1251_s29 }
 0x3ca   :  { %v233_v36 = vpop.xlane.xlu1 %232 }
 0x3cb   :  { %v234_v37 = vrot.slane %v233_v36, 4 }
 0x3cd   :  { %v235_v38 = vadd.f32 %v234_v37, %v233_v36 }
 0x3ce   :  { %v686_v53 = vpop.permute.xlu1 %685 }
 0x3cf   :  { %v236_v39 = vrot.slane %v235_v38, 2 }
 0x3d1   :  { %v237_v40 = vadd.f32 %v236_v39, %v235_v38 }
 0x3d3   :  { %v238_v41 = vrot.slane %v237_v40, 1 }
 0x3d5   :  { %v239_v42 = vadd.f32 %v238_v41, %v237_v40 }
 0x3d7   :  { %1090 = vpush %v239_v42 }
 0x3ff   :  { %v583_v62 = vpop.xlane.xlu1 %582 }
 0x400   :  { %v584_v63 = vrot.slane %v583_v62, 4 }
 0x402   :  { %v585_v2 = vmax.f32 %v583_v62, %v584_v63 }
 0x403   :  { %v609_v34 = vpop.permute.xlu1 %608 }
 0x404   :  { %v586_v5 = vrot.slane %v585_v2, 2 }
 0x406   :  { %v587_v10 = vmax.f32 %v585_v2, %v586_v5 }
 0x408   :  { %s1373_s4 = spop %1090  ;;  %v588_v13 = vrot.slane %v587_v10, 1 }
 0x40a   :  { %v589_v16 = vmax.f32 %v587_v10, %v588_v13  ;;  %v241_v10 = vstv %s1373_s4 }
 0x40f   :  { %v1364_v43 = vpop.f32.mrb[2].mxu1 }
 0x410   :  { %v1034_v44 = vpop.f32.mrb[3].mxu1 }
 0x413   :  { %v395_v45 = vpop.f32.mrb[4].mxu1 }
 0x414   :  { %v1039_v46 = vpop.f32.mrb[5].mxu1  ;;  %v399_v47 = vsel %vm141_vm2, %v395_v45, -inf }
 0x415   :  { %400 = vmax.xlane.f32.xlu0 %v399_v47  ;;  %v59_v47 = vld [vmem:[#allocation7] sm:$0xff] }
 0x42b   :  { %687 = vrot.lane.b32.xlu0 %v1331_v9, %s1252_s30 }
 0x4a2   :  { %v401_v48 = vpop.xlane.xlu0 %400 }
 0x4a3   :  { %v402_v49 = vrot.slane %v401_v48, 4 }
 0x4a5   :  { %v403_v50 = vmax.f32 %v401_v48, %v402_v49  ;;  %v60_v48 = vld [vmem:[#allocation7 + $0x8] sm:$0xff] }
 0x4a6   :  { %v688_v51 = vpop.permute.xlu0 %687  ;;  %v1083_v49 = vpack.c.bf16 %v60_v48, %v59_v47 }
 0x4a7   :  { %v404_v52 = vrot.slane %v403_v50, 2  ;;  %1056 = vmatpush3.xpose.msk.msra.mxu0 %vm141_vm2, %v688_v51 }
 0x4a8   :  { %1082 = vmatprep.subr.bf16.mxu0 %v1241_v0 }
 0x4a9   :  { %v405_v54 = vmax.f32 %v403_v50, %v404_v52  ;;  %v62_v50 = vld [vmem:[#allocation7 + $0x18] sm:$0xff] }
 0x4aa   :  { %1058 = vmatmul.mubr.msk.f32.vlgmr.msra.gmra.mrb[4].mxu0 %vm141_vm2, %v686_v53 }
 0x4ab   :  { %v406_v55 = vrot.slane %v405_v54, 1  ;;  %1073 = vmatprep.mubr.msk.f32.mxu0 %vm1242_vm0, %v1243_v1  ;;  %1084 = vmatpush3.bf16.msra.mxu0 %v1083_v49 }
 0x4ac   :  { %1085 = vmatprep.subr.bf16.mxu0 %v1241_v0 }
 0x4ad   :  { %v407_v56 = vmax.f32 %v405_v54, %v406_v55 }
 0x4af   :  { %1092 = vpush %v407_v56 }
 0x4e0   :  { %s1093_s5 = spop %1092 }
 0x4e1   :  { %v409_v57 = vstv %s1093_s5 }
 0x4e2   :  { %v410_v58 = vsub.f32 %v395_v45, %v409_v57 }
 0x4e4   :  { %v411_v59 = vmul.f32 1.442695, %v410_v58 }
 0x4e6   :  { %1128 = vpow2.f32 %v411_v59 }
 0x4f0   :  { %v1129_v60 = vpop.eup %1128 }
 0x4f1   :  { %v413_v61 = vsel %vm141_vm2, %v1129_v60, 0.0 }
 0x4f2   :  { %414 = vadd.xlane.f32.xlu0 %v413_v61 }
 0x57d   :  { %v759_v3 = vpop.f32.mrb[4].mxu0 }
 0x57e   :  { %v1059_v4 = vpop.f32.mrb[5].mxu0  ;;  %v763_v23 = vsel %vm141_vm2, %v759_v3, -inf }
 0x57f   :  { %v415_v6 = vpop.xlane.xlu0 %414 }
 0x580   :  { %v416_v7 = vrot.slane %v415_v6, 4 }
 0x582   :  { %v417_v8 = vadd.f32 %v416_v7, %v415_v6 }
 0x584   :  { %v418_v11 = vrot.slane %v417_v8, 2 }
 0x586   :  { %v419_v12 = vadd.f32 %v418_v11, %v417_v8 }
 0x588   :  { %v420_v14 = vrot.slane %v419_v12, 1 }
 0x58a   :  { %v421_v15 = vadd.f32 %v420_v14, %v419_v12 }
 0x58c   :  { %1094 = vpush %v421_v15 }
 0x58d   :  { %1096 = vpush %v589_v16 }
 0x5bd   :  { %s1376_s6 = spop %1094 }
 0x5be   :  { %s1097_s7 = spop %1096  ;;  %v423_v45 = vstv %s1376_s6 }
 0x5bf   :  { %v591_v17 = vstv %s1097_s7 }
 0x5c0   :  { %v592_v18 = vsub.f32 %v1350_v21, %v591_v17 }
 0x5c2   :  { %v593_v19 = vmul.f32 1.442695, %v592_v18 }
 0x5c4   :  { %1130 = vpow2.f32 %v593_v19 }
 0x5ce   :  { %v1131_v20 = vpop.eup %1130 }
 0x5cf   :  { %v595_v22 = vsel %vm141_vm2, %v1131_v20, 0.0 }
 0x5d0   :  { %596 = vadd.xlane.f32.xlu0 %v595_v22 }
 0x5d4   :  { %764 = vmax.xlane.f32.xlu0 %v763_v23 }
 0x5ea   :  { %426 = vrot.lane.b32.xlu0 %v1331_v9, %s1253_s8 }
 0x5ee   :  { %790 = vrot.lane.b32.xlu0 %v1331_v9, %s1254_s9 }
 0x65d   :  { %v597_v24 = vpop.xlane.xlu0 %596 }
 0x65e   :  { %v598_v25 = vrot.slane %v597_v24, 4 }
 0x660   :  { %v599_v26 = vadd.f32 %v598_v25, %v597_v24 }
 0x661   :  { %v765_v27 = vpop.xlane.xlu0 %764 }
 0x662   :  { %v600_v21 = vrot.slane %v599_v26, 2  ;;  %v766_v28 = vrot.slane %v765_v27, 4 }
 0x664   :  { %v767_v29 = vmax.f32 %v765_v27, %v766_v28  ;;  %v601_v30 = vadd.f32 %v600_v21, %v599_v26 }
 0x665   :  { %v427_v31 = vpop.permute.xlu0 %426 }
 0x666   :  { %v768_v32 = vrot.slane %v767_v29, 2  ;;  %1041 = vmatpush3.msra.mxu1 %v427_v31  ;;  %v602_v33 = vrot.slane %v601_v30, 1 }
 0x667   :  { %1043 = vmatmul.mubr.msk.f32.vlgmr.msra.gmra.mrb[6].mxu1 %vm141_vm2, %v1129_v60  ;;  %1050 = vmatprep.subr.mxu1 %v1243_v1 }
 0x668   :  { %1051 = vmatpush3.msra.mxu1 %v609_v34  ;;  %v603_v35 = vadd.f32 %v602_v33, %v601_v30  ;;  %1052 = vmatprep.mubr.msk.f32.mxu1 %vm1242_vm0, %v1243_v1  ;;  %v769_v9 = vmax.f32 %v767_v29, %v768_v32 }
 0x669   :  { %v791_v36 = vpop.permute.xlu0 %790  ;;  %1060 = vmatprep.subr.mxu1 %v1243_v1 }
 0x66a   :  { %1098 = vpush %v603_v35  ;;  %v770_v37 = vrot.slane %v769_v9, 1 }
 0x66b   :  { %1053 = vmatmul.mubr.msk.f32.vlgmr.msra.gmra.mrb[8].mxu1 %vm141_vm2, %v1131_v20 }
 0x66c   :  { %1061 = vmatpush3.msra.mxu1 %v791_v36  ;;  %v771_v38 = vmax.f32 %v769_v9, %v770_v37  ;;  %1062 = vmatprep.mubr.msk.f32.mxu1 %vm1242_vm0, %v1243_v1  ;;  %v61_v1 = vld [vmem:[#allocation7 + $0x10] sm:$0xff] }
 0x66d   :  { %v1086_v51 = vpack.c.bf16 %v62_v50, %v61_v1 }
 0x66e   :  { %1100 = vpush %v771_v38 }
 0x66f   :  { %1087 = vmatpush3.bf16.msra.mxu0 %v1086_v51 }
 0x69b   :  { %s1099_s1 = spop %1098 }
 0x69c   :  { %v605_v46 = vstv %s1099_s1 }
 0x69f   :  { %s1101_s10 = spop %1100 }
 0x6a0   :  { %v773_v39 = vstv %s1101_s10 }
 0x6a1   :  { %v774_v40 = vsub.f32 %v759_v3, %v773_v39 }
 0x6a3   :  { %v775_v41 = vmul.f32 1.442695, %v774_v40 }
 0x6a5   :  { %1132 = vpow2.f32 %v775_v41 }
 0x6a6   :  { %1134 = vrcp.f32 %v423_v45 }
 0x6a7   :  { %1136 = vrcp.f32 %v605_v46 }
 0x6af   :  { %v1133_v42 = vpop.eup %1132 }
 0x6b0   :  { %1063 = vmatmul.mubr.msk.f32.vlgmr.msra.gmra.mrb[10].mxu1 %vm141_vm2, %v1133_v42  ;;  %v777_v44 = vsel %vm141_vm2, %v1133_v42, 0.0  ;;  %v1135_v52 = vpop.eup %1134 }
 0x6b1   :  { %778 = vadd.xlane.f32.xlu0 %v777_v44  ;;  %v1137_v56 = vpop.eup %1136 }
 0x73a   :  { %v498_v53 = vpop.f32.mrb[6].mxu1 }
 0x73b   :  { %v502_v54 = vmul.f32 %v1135_v52, %v498_v53  ;;  %v1044_v55 = vpop.f32.mrb[7].mxu1 }
 0x73d   :  { %868 = vrot.lane.b32.xlu1 %v502_v54, %s1238_s23  ;;  %s1256_s23 = smov 24  }
 0x73e   :  { %v680_v57 = vpop.f32.mrb[8].mxu1  ;;  %v779_v58 = vpop.xlane.xlu0 %778 }
 0x73f   :  { %v684_v59 = vmul.f32 %v1137_v56, %v680_v57  ;;  %v780_v60 = vrot.slane %v779_v58, 4  ;;  %v1054_v61 = vpop.f32.mrb[9].mxu1 }
 0x741   :  { %v781_v62 = vadd.f32 %v780_v60, %v779_v58  ;;  %872 = vrot.lane.b32.xlu1 %v684_v59, %s1255_s11 }
 0x743   :  { %v782_v63 = vrot.slane %v781_v62, 2 }
 0x745   :  { %v783_v2 = vadd.f32 %v782_v63, %v781_v62 }
 0x747   :  { %v784_v0 = vrot.slane %v783_v2, 1 }
 0x749   :  { %v785_v3 = vadd.f32 %v784_v0, %v783_v2 }
 0x74b   :  { %1102 = vpush %v785_v3 }
 0x77c   :  { %s1103_s12 = spop %1102 }
 0x77d   :  { %v787_v4 = vstv %s1103_s12 }
 0x77e   :  { %1138 = vrcp.f32 %v787_v4 }
 0x77f   :  { %1140 = vrcp.f32 %v241_v10 }
 0x783   :  { %v862_v5 = vpop.f32.mrb[10].mxu1 }
 0x784   :  { %v1064_v6 = vpop.f32.mrb[11].mxu1 }
 0x788   :  { %v1139_v7 = vpop.eup %1138 }
 0x789   :  { %v866_v8 = vmul.f32 %v1139_v7, %v862_v5  ;;  %v1141_v12 = vpop.eup %1140 }
 0x78a   :  { %v320_v14 = vmul.f32 %v1141_v12, %v1364_v43 }
 0x78b   :  { %876 = vrot.lane.b32.xlu1 %v866_v8, %s1256_s23 }
 0x7af   :  { %v869_v11 = vpop.permute.xlu1 %868 }
 0x7b0   :  { %v879_v15 = vsel %vm141_vm2, %v320_v14, %v869_v11 }
 0x7b3   :  { %v873_v13 = vpop.permute.xlu1 %872 }
 0x7b4   :  { %v881_v16 = vsel %vm880_vm3, %v879_v15, %v873_v13 }
 0x7fd   :  { %v877_v17 = vpop.permute.xlu1 %876 }
 0x7fe   :  { %v883_v18 = vsel %vm882_vm4, %v881_v16, %v877_v17 }
 0x7ff   :  { %1074 = vmatmul.mubr.msk.f32.vlgmr.msra.gmra.mrb[6].mxu0 %vm63_vm1, %v883_v18 }
 0x8d2   :  { %v953_v19 = vpop.f32.mrb[6].mxu0 }
 0x8d3   :  { %957 = vst.msk [vmem:[#allocation8] sm:$0xff] %vm63_vm1, %v953_v19  ;;  %v1075_v20 = vpop.f32.mrb[7].mxu0 }
 0x8d4   :  { %1219 = shalt.err (!%p1216_p0)
}
 0x8d5   :  { %s1220_s18 = scalar_lea.hbm %s1416_s3, 128 }
 0x8d6   :  { %p1221_p1 = scmp.ne.s32.totalorder %s1416_s3, %s1220_s18  ;;  %p1224_p2 = scmp.lt.u32.totalorder %s1220_s18, %s1416_s3 }
 0x8d8   :  { %p1226_p3 = pnand %p1224_p2, %p1221_p1 }
 0x8da   :  { %1229 = shalt.err (!%p1226_p3)
}
 0x8db   :  { %967 = dma.vmem_to_hbm [thread:$0]  %s965_s14, 128, %s1416_s3, [#allocation4]  }
 0x8dc   :  { %1234 = dma.done.wait [#allocation4], 128  }
 0x8dd   :  { %1235 = vsyncadd [#allocation4], 4294967168 }
 0x8de   :  { %971 = vsyncpa [#allocation3], 1 }
 0x8df   :  { %972 = vsyncpa [#allocation6], 1 }
 0x8e0   :  { %973 = vsyncpa [#allocation4], 1 }

</bundles_post_ra>
